<compile_context>
chip_gen: v7x
topology: tpu7x:2x2x1
jax: 0.10.0
libtpu: 0.0.40
codegen_flags: <defaults>
</compile_context>

<pallas_src>
import jax
import jax.numpy as jnp
from jax.experimental import pallas as pl
from jax.experimental.pallas import tpu as pltpu

IN_DIM = 784
HID_DIM = 4
OUT_DIM = 10


def mlp_kernel(x_ref, w1_ref, b1_ref, w2_ref, b2_ref, o_ref):
    # fc_layer_1 (+ bias) + ReLU; MXU accumulates in f32.
    h = jnp.dot(x_ref[...], w1_ref[...], preferred_element_type=jnp.float32)
    h = jnp.maximum(h + b1_ref[...], 0.0)           # (tb, 4) + (1, 4) broadcast

    # fc_layer_2 (+ bias), all f32.
    logits = jnp.dot(h, w2_ref[...], preferred_element_type=jnp.float32)
    logits = logits + b2_ref[...]                   # (tb, 10) + (1, 10) broadcast

    # nn.Softmax(dim=1), numerically stable.  Exact divide so rows sum to 1
    # (approx reciprocal previously violated the sum-to-1 invariant).
    m = jnp.max(logits, axis=-1, keepdims=True)
    e = jnp.exp(logits - m)
    denom = jnp.sum(e, axis=-1, keepdims=True)
    o_ref[...] = (e / denom).astype(o_ref.dtype)


def _round_up(n, m):
    return ((n + m - 1) // m) * m


def _tile_config():
    """Generation-aware (batch_tile, vmem_limit_bytes) for f32 inputs."""
    try:
        kind = jax.devices()[0].device_kind.lower()
    except Exception:
        return 1024, None
    if "v5 lite" in kind or "v5e" in kind or "v5litepod" in kind:
        # f32 x tile at tb=2048 is ~15-16 MiB double-buffered -> raise scoped VMEM.
        return 2048, 28 * 1024 * 1024
    if "v7" in kind:
        # v7x: 64 MiB physical VMEM; tb=4096 f32 is ~34 MiB double-buffered.
        return 4096, 40 * 1024 * 1024
    if "v6" in kind or "trillium" in kind:
        return 4096, 48 * 1024 * 1024
    return 1024, None


def mlp_forward(x, w1, b1, w2, b2, *, tb=None, vmem_limit_bytes=None):
    B = x.shape[0]
    default_tb, default_vmem = _tile_config()
    if tb is None:
        tb = default_tb
    if vmem_limit_bytes is None:
        vmem_limit_bytes = default_vmem

    # Effective tile: multiple of 8 (sublane), never much larger than B.
    # No padding of x: the grid is cdiv(B, tb_eff) and Pallas masks the
    # partial last block (garbage rows are row-local and never written back).
    tb_eff = max(8, min(tb, _round_up(B, 8)))
    grid = (pl.cdiv(B, tb_eff),)

    cp_kwargs = dict(dimension_semantics=("parallel",))
    if vmem_limit_bytes is not None:
        cp_kwargs["vmem_limit_bytes"] = vmem_limit_bytes

    return pl.pallas_call(
        mlp_kernel,
        out_shape=jax.ShapeDtypeStruct((B, OUT_DIM), jnp.float32),
        grid_spec=pltpu.PrefetchScalarGridSpec(
            num_scalar_prefetch=0,
            grid=grid,
            in_specs=[
                pl.BlockSpec((tb_eff, IN_DIM), lambda i: (i, 0)),    # x tile
                pl.BlockSpec((IN_DIM, HID_DIM), lambda i: (0, 0)),   # W1 (full)
                pl.BlockSpec((1, HID_DIM), lambda i: (0, 0)),        # b1
                pl.BlockSpec((HID_DIM, OUT_DIM), lambda i: (0, 0)),  # W2 (full)
                pl.BlockSpec((1, OUT_DIM), lambda i: (0, 0)),        # b2
            ],
            out_specs=pl.BlockSpec((tb_eff, OUT_DIM), lambda i: (i, 0)),
        ),
        compiler_params=pltpu.CompilerParams(**cp_kwargs),
    )(x, w1, b1, w2, b2)


def init_params(key):
    # Deterministic init mimicking torch.nn.Linear: U(-1/sqrt(fan_in), 1/sqrt(fan_in))
    k1, k2, k3, k4 = jax.random.split(key, 4)
    bound1 = 1.0 / jnp.sqrt(IN_DIM)
    bound2 = 1.0 / jnp.sqrt(HID_DIM)
    w1 = jax.random.uniform(k1, (IN_DIM, HID_DIM), jnp.float32, -bound1, bound1)
    b1 = jax.random.uniform(k2, (1, HID_DIM), jnp.float32, -bound1, bound1)
    w2 = jax.random.uniform(k3, (HID_DIM, OUT_DIM), jnp.float32, -bound2, bound2)
    b2 = jax.random.uniform(k4, (1, OUT_DIM), jnp.float32, -bound2, bound2)
    return w1, b1, w2, b2


if __name__ == "__main__":
    key = jax.random.PRNGKey(0)
    kx, kp = jax.random.split(key)

    B = 32  # small batch for the smoke test (wrapper handles arbitrary B)
    x = jax.random.normal(kx, (B, IN_DIM), jnp.float32)
    w1, b1, w2, b2 = init_params(kp)

    y = mlp_forward(x, w1, b1, w2, b2)
    y = jax.block_until_ready(y)

    # Pure f32 reference (matches the torch forward semantics).
    h_ref = jnp.maximum(jnp.dot(x, w1, preferred_element_type=jnp.float32) + b1, 0.0)
    y_ref = jax.nn.softmax(
        jnp.dot(h_ref, w2, preferred_element_type=jnp.float32) + b2, axis=1)

    assert y.shape == (B, OUT_DIM)
    assert bool(jnp.all(jnp.isfinite(y))), "non-finite probabilities"
    assert jnp.allclose(y, y_ref, atol=1e-2), "mismatch vs reference"
    assert jnp.allclose(jnp.sum(y, axis=1), 1.0, atol=1e-5), "softmax rows must sum to 1"

    print("KERNEL_OK")
</pallas_src>

<mosaic_0001>
module attributes {stable_mosaic.version = 11 : i64} {
  func.func @mlp_kernel(%arg0: i32, %arg1: memref<32x784xf32, #tpu.memory_space<vmem>>, %arg2: memref<784x4xf32, #tpu.memory_space<vmem>>, %arg3: memref<1x4xf32, #tpu.memory_space<vmem>>, %arg4: memref<4x10xf32, #tpu.memory_space<vmem>>, %arg5: memref<1x10xf32, #tpu.memory_space<vmem>>, %arg6: memref<32x10xf32, #tpu.memory_space<vmem>>) attributes {dimension_semantics = [#tpu.dimension_semantics<parallel>], iteration_bounds = array<i64: 1>, scalar_prefetch = 0 : i64, scratch_operands = 0 : i64, tpu.core_type = #tpu.core_type<tc>, window_params = [{transform_indices = @transform_0, window_bounds = array<i64: 32, 784>}, {pipeline_mode = #tpu.pipeline_mode<synchronous>, transform_indices = @transform_1, window_bounds = array<i64: 784, 4>}, {pipeline_mode = #tpu.pipeline_mode<synchronous>, transform_indices = @transform_2, window_bounds = array<i64: 1, 4>}, {pipeline_mode = #tpu.pipeline_mode<synchronous>, transform_indices = @transform_3, window_bounds = array<i64: 4, 10>}, {pipeline_mode = #tpu.pipeline_mode<synchronous>, transform_indices = @transform_4, window_bounds = array<i64: 1, 10>}, {transform_indices = @transform_5, window_bounds = array<i64: 32, 10>}]} {
    %c0 = arith.constant 0 : index
    %c0_0 = arith.constant 0 : index
    %0 = vector.load %arg1[%c0, %c0_0] : memref<32x784xf32, #tpu.memory_space<vmem>>, vector<32x784xf32>
    %c0_1 = arith.constant 0 : index
    %c0_2 = arith.constant 0 : index
    %1 = vector.load %arg2[%c0_1, %c0_2] : memref<784x4xf32, #tpu.memory_space<vmem>>, vector<784x4xf32>
    %cst = arith.constant dense<0.000000e+00> : vector<32x4xf32>
    %2 = tpu.matmul %0, %1, %cst {dimension_numbers = #tpu.dot_dimension_numbers<[1], [0], [0], [1], [0, 0, 1, 1], [], []>} : vector<32x784xf32>, vector<784x4xf32>, vector<32x4xf32> -> vector<32x4xf32>
    %c0_3 = arith.constant 0 : index
    %c0_4 = arith.constant 0 : index
    %3 = vector.load %arg3[%c0_3, %c0_4] : memref<1x4xf32, #tpu.memory_space<vmem>>, vector<1x4xf32>
    %4 = vector.broadcast %3 : vector<1x4xf32> to vector<32x4xf32>
    %5 = arith.addf %2, %4 : vector<32x4xf32>
    %cst_5 = arith.constant 0.000000e+00 : f32
    %6 = vector.broadcast %cst_5 : f32 to vector<32x4xf32>
    %7 = arith.maximumf %5, %6 : vector<32x4xf32>
    %c0_6 = arith.constant 0 : index
    %c0_7 = arith.constant 0 : index
    %8 = vector.load %arg4[%c0_6, %c0_7] : memref<4x10xf32, #tpu.memory_space<vmem>>, vector<4x10xf32>
    %cst_8 = arith.constant dense<0.000000e+00> : vector<32x10xf32>
    %9 = tpu.matmul %7, %8, %cst_8 {dimension_numbers = #tpu.dot_dimension_numbers<[1], [0], [0], [1], [0, 0, 1, 1], [], []>} : vector<32x4xf32>, vector<4x10xf32>, vector<32x10xf32> -> vector<32x10xf32>
    %c0_9 = arith.constant 0 : index
    %c0_10 = arith.constant 0 : index
    %10 = vector.load %arg5[%c0_9, %c0_10] : memref<1x10xf32, #tpu.memory_space<vmem>>, vector<1x10xf32>
    %11 = vector.broadcast %10 : vector<1x10xf32> to vector<32x10xf32>
    %12 = arith.addf %9, %11 : vector<32x10xf32>
    %cst_11 = arith.constant dense<0xFF800000> : vector<32xf32>
    %13 = vector.multi_reduction <maximumf>, %12, %cst_11 [1] : vector<32x10xf32> to vector<32xf32>
    %14 = vector.shape_cast %13 : vector<32xf32> to vector<32x1xf32>
    %15 = vector.broadcast %14 : vector<32x1xf32> to vector<32x10xf32>
    %16 = arith.subf %12, %15 : vector<32x10xf32>
    %17 = math.exp %16 : vector<32x10xf32>
    %cst_12 = arith.constant dense<0.000000e+00> : vector<32xf32>
    %18 = vector.multi_reduction <add>, %17, %cst_12 [1] : vector<32x10xf32> to vector<32xf32>
    %19 = vector.shape_cast %18 : vector<32xf32> to vector<32x1xf32>
    %20 = vector.broadcast %19 : vector<32x1xf32> to vector<32x10xf32>
    %21 = arith.divf %17, %20 : vector<32x10xf32>
    %c0_13 = arith.constant 0 : index
    %c0_14 = arith.constant 0 : index
    %22 = vector.load %arg6[%c0_13, %c0_14] : memref<32x10xf32, #tpu.memory_space<vmem>>, vector<32x10xf32>
    tpu.vector_store %arg6[%c0_13, %c0_14], %21 {strides = array<i32>} : memref<32x10xf32, #tpu.memory_space<vmem>>, vector<32x10xf32>,
    return
  }
  func.func @transform_0(%arg0: i32) -> (i32, i32) {
    %c0_i32 = arith.constant 0 : i32
    %c0_i32_0 = arith.constant 0 : i32
    return %arg0, %c0_i32 : i32, i32
  }
  func.func @transform_1(%arg0: i32) -> (i32, i32) {
    %c0_i32 = arith.constant 0 : i32
    %c0_i32_0 = arith.constant 0 : i32
    %c0_i32_1 = arith.constant 0 : i32
    return %c0_i32, %c0_i32_0 : i32, i32
  }
  func.func @transform_2(%arg0: i32) -> (i32, i32) {
    %c0_i32 = arith.constant 0 : i32
    %c0_i32_0 = arith.constant 0 : i32
    %c0_i32_1 = arith.constant 0 : i32
    return %c0_i32, %c0_i32_0 : i32, i32
  }
  func.func @transform_3(%arg0: i32) -> (i32, i32) {
    %c0_i32 = arith.constant 0 : i32
    %c0_i32_0 = arith.constant 0 : i32
    %c0_i32_1 = arith.constant 0 : i32
    return %c0_i32, %c0_i32_0 : i32, i32
  }
  func.func @transform_4(%arg0: i32) -> (i32, i32) {
    %c0_i32 = arith.constant 0 : i32
    %c0_i32_0 = arith.constant 0 : i32
    %c0_i32_1 = arith.constant 0 : i32
    return %c0_i32, %c0_i32_0 : i32, i32
  }
  func.func @transform_5(%arg0: i32) -> (i32, i32) {
    %c0_i32 = arith.constant 0 : i32
    %c0_i32_0 = arith.constant 0 : i32
    return %arg0, %c0_i32 : i32, i32
  }
}

</mosaic_0001>

<bundles_post_ra>
// kernel: tpu_custom_call.1
= control target key start
LH: loop header
LB: loop body
LE: loop exit
PB: predicated region body
PF: predicated region fallthrough
CT: control target
= control target key end

     0   :  { %vm153_vm0 = vcmask 130048   ;;  %vm531_vm1 = vcmask 1043456   ;;  %vm518_vm2 = vcmask 31744   ;;  %vm620_vm3 = vcmask 80896   ;;  %s1410_s1 = inlined_call_operand.vmem [shape: f32[784,4], index: 1, kind: input, shape index: {}]   ;;  %s1411_s0 = inlined_call_operand.vmem [shape: f32[32,784], index: 0, kind: input, shape index: {}]   ;;  %s1412_s3 = inlined_call_operand.vmem [shape: f32[4,10], index: 3, kind: input, shape index: {}]   ;;  %s1413_s2 = inlined_call_operand.vmem [shape: f32[1,4], index: 2, kind: input, shape index: {}]   ;;  %s1414_s4 = inlined_call_operand.vmem [shape: f32[1,10], index: 4, kind: input, shape index: {}]   ;;  %s1415_s5 = inlined_call_operand.vmem [shape: f32[32,10], index: 5, kind: output, shape index: {}]  }
   0x1   :  { %v64_v0 = vld [vmem:[%s1410_s1 + $0x80] sm:$0xff]  ;;  %v65_v1 = vld [vmem:[%s1410_s1 + $0x88] sm:$0xff]  ;;  %v66_v11 = vld [vmem:[%s1410_s1 + $0x90] sm:$0xff] }
   0x2   :  { %v48_v2 = vld [vmem:[%s1410_s1] sm:$0xff]  ;;  %v845_v3 = vpack.c.bf16 %v65_v1, %v64_v0  ;;  %v49_v4 = vld [vmem:[%s1410_s1 + $0x8] sm:$0xff]  ;;  %v67_v13 = vld [vmem:[%s1410_s1 + $0x98] sm:$0xff] }
   0x3   :  { %v96_v5 = vld [vmem:[%s1410_s1 + $0x180] sm:$0xff]  ;;  %v97_v6 = vld [vmem:[%s1410_s1 + $0x188] sm:$0xff]  ;;  %v847_v7 = vpack.c.bf16 %v49_v4, %v48_v2  ;;  %v50_v14 = vld [vmem:[%s1410_s1 + $0x10] sm:$0xff]  ;;  %v849_v16 = vpack.c.bf16 %v67_v13, %v66_v11 }
   0x4   :  { %v877_v8 = vpack.c.bf16 %v97_v6, %v96_v5  ;;  %v80_v9 = vld [vmem:[%s1410_s1 + $0x100] sm:$0xff]  ;;  %v81_v10 = vld [vmem:[%s1410_s1 + $0x108] sm:$0xff]  ;;  %846 = vmatprep.subr.bf16.mxu0 %v845_v3  ;;  %v51_v15 = vld [vmem:[%s1410_s1 + $0x18] sm:$0xff] }
   0x5   :  { %v879_v12 = vpack.c.bf16 %v81_v10, %v80_v9  ;;  %848 = vmatpush3.bf16.msra.mxu0 %v847_v7  ;;  %v851_v17 = vpack.c.bf16 %v51_v15, %v50_v14  ;;  %v98_v18 = vld [vmem:[%s1410_s1 + $0x190] sm:$0xff]  ;;  %v99_v19 = vld [vmem:[%s1410_s1 + $0x198] sm:$0xff]  ;;  %v68_v23 = vld [vmem:[%s1410_s1 + $0xa0] sm:$0xff] }
   0x6   :  { %878 = vmatprep.subr.bf16.mxu1 %v877_v8  ;;  %v82_v20 = vld [vmem:[%s1410_s1 + $0x110] sm:$0xff]  ;;  %v881_v21 = vpack.c.bf16 %v99_v19, %v98_v18  ;;  %v83_v22 = vld [vmem:[%s1410_s1 + $0x118] sm:$0xff]  ;;  %v69_v24 = vld [vmem:[%s1410_s1 + $0xa8] sm:$0xff]  ;;  %850 = vmatprep.subr.bf16.mxu0 %v849_v16 }
   0x7   :  { %880 = vmatpush3.bf16.msra.mxu1 %v879_v12  ;;  %v883_v25 = vpack.c.bf16 %v83_v22, %v82_v20  ;;  %v853_v26 = vpack.c.bf16 %v69_v24, %v68_v23  ;;  %v52_v27 = vld [vmem:[%s1410_s1 + $0x20] sm:$0xff]  ;;  %v53_v28 = vld [vmem:[%s1410_s1 + $0x28] sm:$0xff]  ;;  %v70_v35 = vld [vmem:[%s1410_s1 + $0xb0] sm:$0xff] }
   0x8   :  { %v100_v29 = vld [vmem:[%s1410_s1 + $0x1a0] sm:$0xff]  ;;  %882 = vmatprep.subr.bf16.mxu1 %v881_v21  ;;  %v101_v30 = vld [vmem:[%s1410_s1 + $0x1a8] sm:$0xff]  ;;  %v855_v33 = vpack.c.bf16 %v53_v28, %v52_v27  ;;  %v71_v36 = vld [vmem:[%s1410_s1 + $0xb8] sm:$0xff] }
   0x9   :  { %v84_v31 = vld [vmem:[%s1410_s1 + $0x120] sm:$0xff]  ;;  %v85_v32 = vld [vmem:[%s1410_s1 + $0x128] sm:$0xff]  ;;  %852 = vmatpush3.bf16.msra.mxu0 %v851_v17  ;;  %v885_v34 = vpack.c.bf16 %v101_v30, %v100_v29  ;;  %v54_v37 = vld [vmem:[%s1410_s1 + $0x30] sm:$0xff]  ;;  %v857_v39 = vpack.c.bf16 %v71_v36, %v70_v35 }
   0xa   :  { %854 = vmatprep.subr.bf16.mxu0 %v853_v26  ;;  %v887_v38 = vpack.c.bf16 %v85_v32, %v84_v31  ;;  %v55_v40 = vld [vmem:[%s1410_s1 + $0x38] sm:$0xff]  ;;  %v102_v41 = vld [vmem:[%s1410_s1 + $0x1b0] sm:$0xff]  ;;  %v72_v46 = vld [vmem:[%s1410_s1 + $0xc0] sm:$0xff] }
   0xb   :  { %884 = vmatpush3.bf16.msra.mxu1 %v883_v25  ;;  %v103_v42 = vld [vmem:[%s1410_s1 + $0x1b8] sm:$0xff]  ;;  %v86_v44 = vld [vmem:[%s1410_s1 + $0x130] sm:$0xff]  ;;  %v73_v47 = vld [vmem:[%s1410_s1 + $0xc8] sm:$0xff]  ;;  %v859_v48 = vpack.c.bf16 %v55_v40, %v54_v37 }
   0xc   :  { %886 = vmatprep.subr.bf16.mxu1 %v885_v34  ;;  %v889_v43 = vpack.c.bf16 %v103_v42, %v102_v41  ;;  %v87_v45 = vld [vmem:[%s1410_s1 + $0x138] sm:$0xff]  ;;  %v104_v49 = vld [vmem:[%s1410_s1 + $0x1c0] sm:$0xff]  ;;  %v105_v50 = vld [vmem:[%s1410_s1 + $0x1c8] sm:$0xff]  ;;  %v861_v52 = vpack.c.bf16 %v73_v47, %v72_v46 }
   0xd   :  { %856 = vmatpush3.bf16.msra.mxu0 %v855_v33  ;;  %v891_v51 = vpack.c.bf16 %v87_v45, %v86_v44  ;;  %v56_v53 = vld [vmem:[%s1410_s1 + $0x40] sm:$0xff]  ;;  %v57_v54 = vld [vmem:[%s1410_s1 + $0x48] sm:$0xff]  ;;  %v893_v56 = vpack.c.bf16 %v105_v50, %v104_v49  ;;  %v74_v58 = vld [vmem:[%s1410_s1 + $0xd0] sm:$0xff] }
   0xe   :  { %858 = vmatprep.subr.bf16.mxu0 %v857_v39  ;;  %v88_v55 = vld [vmem:[%s1410_s1 + $0x140] sm:$0xff]  ;;  %v89_v57 = vld [vmem:[%s1410_s1 + $0x148] sm:$0xff]  ;;  %v75_v59 = vld [vmem:[%s1410_s1 + $0xd8] sm:$0xff]  ;;  %v863_v62 = vpack.c.bf16 %v57_v54, %v56_v53 }
   0xf   :  { %888 = vmatpush3.bf16.msra.mxu1 %v887_v38  ;;  %v106_v60 = vld [vmem:[%s1410_s1 + $0x1d0] sm:$0xff]  ;;  %v107_v61 = vld [vmem:[%s1410_s1 + $0x1d8] sm:$0xff]  ;;  %v895_v63 = vpack.c.bf16 %v89_v57, %v88_v55  ;;  %v865_v0 = vpack.c.bf16 %v75_v59, %v74_v58  ;;  %v76_v6 = vld [vmem:[%s1410_s1 + $0xe0] sm:$0xff] }
  0x10   :  { %890 = vmatprep.subr.bf16.mxu1 %v889_v43  ;;  %v58_v1 = vld [vmem:[%s1410_s1 + $0x50] sm:$0xff]  ;;  %v59_v2 = vld [vmem:[%s1410_s1 + $0x58] sm:$0xff]  ;;  %v897_v4 = vpack.c.bf16 %v107_v61, %v106_v60  ;;  %v77_v7 = vld [vmem:[%s1410_s1 + $0xe8] sm:$0xff] }
  0x11   :  { %860 = vmatpush3.bf16.msra.mxu0 %v859_v48  ;;  %v90_v3 = vld [vmem:[%s1410_s1 + $0x150] sm:$0xff]  ;;  %v91_v5 = vld [vmem:[%s1410_s1 + $0x158] sm:$0xff]  ;;  %v108_v8 = vld [vmem:[%s1410_s1 + $0x1e0] sm:$0xff]  ;;  %v867_v10 = vpack.c.bf16 %v59_v2, %v58_v1  ;;  %v869_v14 = vpack.c.bf16 %v77_v7, %v76_v6 }
  0x12   :  { %862 = vmatprep.subr.bf16.mxu0 %v861_v52  ;;  %v109_v9 = vld [vmem:[%s1410_s1 + $0x1e8] sm:$0xff]  ;;  %v60_v11 = vld [vmem:[%s1410_s1 + $0x60] sm:$0xff]  ;;  %v899_v13 = vpack.c.bf16 %v91_v5, %v90_v3  ;;  %v78_v19 = vld [vmem:[%s1410_s1 + $0xf0] sm:$0xff] }
  0x13   :  { %892 = vmatpush3.bf16.msra.mxu1 %v891_v51  ;;  %v21_v12 = vld [vmem:[%s1411_s0 + $0x8] sm:$0xff]  ;;  %v92_v16 = vld [vmem:[%s1410_s1 + $0x160] sm:$0xff]  ;;  %v901_v18 = vpack.c.bf16 %v109_v9, %v108_v8  ;;  %v79_v20 = vld [vmem:[%s1410_s1 + $0xf8] sm:$0xff] }
  0x14   :  { %894 = vmatprep.subr.bf16.mxu1 %v893_v56  ;;  %v61_v15 = vld [vmem:[%s1410_s1 + $0x68] sm:$0xff]  ;;  %230 = vmatprep.mubr.f32.mxu0 %v21_v12  ;;  %v23_v21 = vld [vmem:[%s1411_s0 + $0x18] sm:$0xff]  ;;  %v110_v22 = vld [vmem:[%s1410_s1 + $0x1f0] sm:$0xff]  ;;  %v873_v26 = vpack.c.bf16 %v79_v20, %v78_v19 }
  0x15   :  { %864 = vmatpush3.bf16.msra.mxu0 %v863_v62  ;;  %v93_v17 = vld [vmem:[%s1410_s1 + $0x168] sm:$0xff]  ;;  %v111_v23 = vld [vmem:[%s1410_s1 + $0x1f8] sm:$0xff]  ;;  %315 = vmatprep.mubr.f32.mxu1 %v23_v21  ;;  %v871_v24 = vpack.c.bf16 %v61_v15, %v60_v11  ;;  %v62_v27 = vld [vmem:[%s1410_s1 + $0x70] sm:$0xff] }
  0x16   :  { %866 = vmatprep.subr.bf16.mxu0 %v865_v0  ;;  %v903_v25 = vpack.c.bf16 %v93_v17, %v92_v16  ;;  %v63_v28 = vld [vmem:[%s1410_s1 + $0x78] sm:$0xff]  ;;  %v94_v29 = vld [vmem:[%s1410_s1 + $0x170] sm:$0xff]  ;;  %v905_v30 = vpack.c.bf16 %v111_v23, %v110_v22  ;;  %v128_v32 = vld [vmem:[%s1410_s1 + $0x280] sm:$0xff] }
  0x17   :  { %896 = vmatpush3.bf16.msra.mxu1 %v895_v63  ;;  %v95_v31 = vld [vmem:[%s1410_s1 + $0x178] sm:$0xff]  ;;  %v129_v33 = vld [vmem:[%s1410_s1 + $0x288] sm:$0xff]  ;;  %v875_v34 = vpack.c.bf16 %v63_v28, %v62_v27  ;;  %v112_v37 = vld [vmem:[%s1410_s1 + $0x200] sm:$0xff] }
  0x18   :  { %898 = vmatprep.subr.bf16.mxu1 %v897_v4  ;;  %v907_v35 = vpack.c.bf16 %v95_v31, %v94_v29  ;;  %v909_v36 = vpack.c.bf16 %v129_v33, %v128_v32  ;;  %v113_v38 = vld [vmem:[%s1410_s1 + $0x208] sm:$0xff]  ;;  %v130_v39 = vld [vmem:[%s1410_s1 + $0x290] sm:$0xff]  ;;  %v131_v40 = vld [vmem:[%s1410_s1 + $0x298] sm:$0xff] }
  0x19   :  { %868 = vmatpush3.bf16.msra.mxu0 %v867_v10  ;;  %v20_v41 = vld [vmem:[%s1411_s0] sm:$0xff]  ;;  %v911_v42 = vpack.c.bf16 %v113_v38, %v112_v37  ;;  %v22_v43 = vld [vmem:[%s1411_s0 + $0x10] sm:$0xff]  ;;  %v913_v44 = vpack.c.bf16 %v131_v40, %v130_v39  ;;  %v115_v46 = vld [vmem:[%s1410_s1 + $0x218] sm:$0xff] }
  0x1a   :  { %870 = vmatprep.subr.bf16.mxu0 %v869_v14  ;;  %v114_v45 = vld [vmem:[%s1410_s1 + $0x210] sm:$0xff]  ;;  %v132_v47 = vld [vmem:[%s1410_s1 + $0x2a0] sm:$0xff]  ;;  %v133_v48 = vld [vmem:[%s1410_s1 + $0x2a8] sm:$0xff] }
  0x1b   :  { %900 = vmatpush3.bf16.msra.mxu1 %v899_v13  ;;  %v28_v49 = vld [vmem:[%s1411_s0 + $0x40] sm:$0xff]  ;;  %v30_v50 = vld [vmem:[%s1411_s0 + $0x50] sm:$0xff]  ;;  %v145_v52 = vld [vmem:[%s1410_s1 + $0x308] sm:$0xff]  ;;  %v915_v53 = vpack.c.bf16 %v115_v46, %v114_v45  ;;  %v917_v56 = vpack.c.bf16 %v133_v48, %v132_v47 }
  0x1c   :  { %902 = vmatprep.subr.bf16.mxu1 %v901_v18  ;;  %v144_v51 = vld [vmem:[%s1410_s1 + $0x300] sm:$0xff]  ;;  %v27_v54 = vld [vmem:[%s1411_s0 + $0x38] sm:$0xff]  ;;  %v117_v58 = vld [vmem:[%s1410_s1 + $0x228] sm:$0xff] }
  0x1d   :  { %872 = vmatpush3.bf16.msra.mxu0 %v871_v24  ;;  %v941_v55 = vpack.c.bf16 %v145_v52, %v144_v51  ;;  %v116_v57 = vld [vmem:[%s1410_s1 + $0x220] sm:$0xff]  ;;  %v29_v59 = vld [vmem:[%s1411_s0 + $0x48] sm:$0xff]  ;;  %v134_v60 = vld [vmem:[%s1410_s1 + $0x2b0] sm:$0xff] }
  0x1e   :  { %874 = vmatprep.subr.bf16.mxu0 %v873_v26  ;;  %v135_v61 = vld [vmem:[%s1410_s1 + $0x2b8] sm:$0xff]  ;;  %v37_v63 = vld [vmem:[%s1411_s0 + $0x88] sm:$0xff]  ;;  %v919_v0 = vpack.c.bf16 %v117_v58, %v116_v57  ;;  %v34_v1 = vld [vmem:[%s1411_s0 + $0x70] sm:$0xff] }
  0x1f   :  { %904 = vmatpush3.bf16.msra.mxu1 %v903_v25  ;;  %v35_v62 = vld [vmem:[%s1411_s0 + $0x78] sm:$0xff]  ;;  %v921_v2 = vpack.c.bf16 %v135_v61, %v134_v60  ;;  %v118_v3 = vld [vmem:[%s1410_s1 + $0x230] sm:$0xff]  ;;  %v36_v5 = vld [vmem:[%s1411_s0 + $0x80] sm:$0xff] }
  0x20   :  { %906 = vmatprep.subr.bf16.mxu1 %v905_v30  ;;  %v119_v4 = vld [vmem:[%s1410_s1 + $0x238] sm:$0xff]  ;;  %v136_v6 = vld [vmem:[%s1410_s1 + $0x2c0] sm:$0xff]  ;;  %v137_v7 = vld [vmem:[%s1410_s1 + $0x2c8] sm:$0xff] }
  0x21   :  { %876 = vmatpush3.bf16.msra.mxu0 %v875_v34  ;;  %v42_v8 = vld [vmem:[%s1411_s0 + $0xb0] sm:$0xff]  ;;  %v44_v9 = vld [vmem:[%s1411_s0 + $0xc0] sm:$0xff]  ;;  %v923_v10 = vpack.c.bf16 %v119_v4, %v118_v3  ;;  %v41_v11 = vld [vmem:[%s1411_s0 + $0xa8] sm:$0xff]  ;;  %v925_v12 = vpack.c.bf16 %v137_v7, %v136_v6 }
  0x22   :  { %910 = vmatprep.subr.bf16.mxu0 %v909_v36  ;;  %v120_v13 = vld [vmem:[%s1410_s1 + $0x240] sm:$0xff]  ;;  %v121_v14 = vld [vmem:[%s1410_s1 + $0x248] sm:$0xff]  ;;  %v43_v15 = vld [vmem:[%s1411_s0 + $0xb8] sm:$0xff] }
  0x23   :  { %908 = vmatpush3.bf16.msra.mxu1 %v907_v35  ;;  %v138_v16 = vld [vmem:[%s1410_s1 + $0x2d0] sm:$0xff]  ;;  %v139_v17 = vld [vmem:[%s1410_s1 + $0x2d8] sm:$0xff]  ;;  %v25_v18 = vld [vmem:[%s1411_s0 + $0x28] sm:$0xff]  ;;  %v927_v20 = vpack.c.bf16 %v121_v14, %v120_v13 }
  0x24   :  { %231 = vmatmul.mubr.f32.vlgmr.msra.gmra.mrb[0].mxu0 %v20_v41  ;;  %942 = vmatprep.subr.bf16.mxu1 %v941_v55  ;;  %v26_v19 = vld [vmem:[%s1411_s0 + $0x30] sm:$0xff]  ;;  %v929_v21 = vpack.c.bf16 %v139_v17, %v138_v16  ;;  %v123_v23 = vld [vmem:[%s1410_s1 + $0x258] sm:$0xff]  ;;  %v33_v24 = vld [vmem:[%s1411_s0 + $0x68] sm:$0xff] }
  0x25   :  { %912 = vmatpush3.bf16.msra.mxu0 %v911_v42  ;;  %235 = vmatprep.mubr.f32.mxu0 %v28_v49  ;;  %v122_v22 = vld [vmem:[%s1410_s1 + $0x250] sm:$0xff]  ;;  %v140_v25 = vld [vmem:[%s1410_s1 + $0x2e0] sm:$0xff]  ;;  %v141_v26 = vld [vmem:[%s1410_s1 + $0x2e8] sm:$0xff] }
  0x26   :  { %316 = vmatmul.mubr.f32.vlgmr.msra.gmra.mrb[0].mxu1 %v22_v43  ;;  %914 = vmatprep.subr.bf16.mxu0 %v913_v44  ;;  %v40_v27 = vld [vmem:[%s1411_s0 + $0xa0] sm:$0xff]  ;;  %v931_v28 = vpack.c.bf16 %v123_v23, %v122_v22  ;;  %v933_v29 = vpack.c.bf16 %v141_v26, %v140_v25  ;;  %v125_v31 = vld [vmem:[%s1410_s1 + $0x268] sm:$0xff]  ;;  %v47_v32 = vld [vmem:[%s1411_s0 + $0xd8] sm:$0xff] }
  0x27   :  { %320 = vmatprep.mubr.f32.mxu1 %v30_v50  ;;  %944 = vmatpush3.bf16.msra.mxu1 %v941_v55  ;;  %v124_v30 = vld [vmem:[%s1410_s1 + $0x260] sm:$0xff]  ;;  %v142_v33 = vld [vmem:[%s1410_s1 + $0x2f0] sm:$0xff]  ;;  %v143_v34 = vld [vmem:[%s1410_s1 + $0x2f8] sm:$0xff] }
  0x28   :  { %236 = vmatmul.mubr.f32.gmra.mrb[2].mxu0 %v27_v54  ;;  %v935_v35 = vpack.c.bf16 %v125_v31, %v124_v30  ;;  %v937_v36 = vpack.c.bf16 %v143_v34, %v142_v33  ;;  %v126_v37 = vld [vmem:[%s1410_s1 + $0x270] sm:$0xff]  ;;  %v127_v38 = vld [vmem:[%s1410_s1 + $0x278] sm:$0xff]  ;;  %v24_v40 = vld [vmem:[%s1411_s0 + $0x20] sm:$0xff] }
  0x29   :  { %916 = vmatpush3.bf16.msra.mxu0 %v915_v53  ;;  %240 = vmatprep.mubr.f32.mxu0 %v35_v62  ;;  %v939_v39 = vpack.c.bf16 %v127_v38, %v126_v37  ;;  %v32_v41 = vld [vmem:[%s1411_s0 + $0x60] sm:$0xff]  ;;  %v31_v42 = vld [vmem:[%s1411_s0 + $0x58] sm:$0xff]  ;;  %v38_v44 = vld [vmem:[%s1411_s0 + $0x90] sm:$0xff] }
  0x2a   :  { %321 = vmatmul.mubr.f32.gmra.mrb[2].mxu1 %v29_v59  ;;  %918 = vmatprep.subr.bf16.mxu0 %v917_v56  ;;  %v39_v43 = vld [vmem:[%s1411_s0 + $0x98] sm:$0xff]  ;;  %v46_v45 = vld [vmem:[%s1411_s0 + $0xd0] sm:$0xff]  ;;  %v45_v46 = vld [vmem:[%s1411_s0 + $0xc8] sm:$0xff] }
  0x2b   :  { %325 = vmatprep.mubr.f32.mxu1 %v37_v63  ;;  %v510_v47 = vld [vmem:[%s1412_s3] sm:$0xf] }
  0x2c   :  { %241 = vmatmul.mubr.f32.gmra.mrb[4].mxu0 %v34_v1  ;;  %837 = vmatprep.subr.msk.mxu1 %vm531_vm1, %v510_v47  ;;  %v673_v49 = vld [vmem:[%s1413_s2] ss:$0 sm:$0xff] }
  0x2d   :  { %920 = vmatpush3.bf16.msra.mxu0 %v919_v0  ;;  %245 = vmatprep.mubr.f32.mxu0 %v42_v8 }
  0x2e   :  { %326 = vmatmul.mubr.f32.gmra.mrb[4].mxu1 %v36_v5  ;;  %922 = vmatprep.subr.bf16.mxu0 %v921_v2 }
  0x2f   :  { %330 = vmatprep.mubr.f32.mxu1 %v44_v9 }
  0x30   :  { %246 = vmatmul.mubr.f32.gmra.mrb[6].mxu0 %v41_v11 }
  0x31   :  { %924 = vmatpush3.bf16.msra.mxu0 %v923_v10  ;;  %400 = vmatprep.mubr.f32.mxu0 %v25_v18 }
  0x32   :  { %331 = vmatmul.mubr.f32.gmra.mrb[6].mxu1 %v43_v15  ;;  %926 = vmatprep.subr.bf16.mxu0 %v925_v12 }
  0x33   :  { %831 = vmatprep.mubr.msk.f32.mxu1 %vm153_vm0, %v26_v19 }
  0x35   :  { %928 = vmatpush3.bf16.msra.mxu0 %v927_v20 }
  0x36   :  { %832 = vmatmul.mubr.msk.f32.vlgmr.msra.gmra.mrb[8].mxu1 %vm153_vm0, %v33_v24  ;;  %930 = vmatprep.subr.bf16.mxu0 %v929_v21 }
  0x37   :  { %834 = vmatprep.mubr.msk.f32.mxu1 %vm153_vm0, %v40_v27  ;;  %838 = vmatpush3.msk.msra.mxu1 %vm531_vm1, %v510_v47 }
  0x39   :  { %932 = vmatpush3.bf16.msra.mxu0 %v931_v28 }
  0x3a   :  { %835 = vmatmul.mubr.msk.f32.gmra.mrb[10].mxu1 %vm153_vm0, %v47_v32  ;;  %934 = vmatprep.subr.bf16.mxu0 %v933_v29 }
  0x3d   :  { %936 = vmatpush3.bf16.msra.mxu0 %v935_v35 }
  0x3e   :  { %938 = vmatprep.subr.bf16.mxu0 %v937_v36 }
  0x41   :  { %940 = vmatpush3.bf16.msra.mxu0 %v939_v39 }
  0x44   :  { %401 = vmatmul.mubr.f32.vlgmr.msra.gmra.mrb[8].mxu0 %v24_v40 }
  0x45   :  { %405 = vmatprep.mubr.f32.mxu0 %v32_v41 }
  0x48   :  { %406 = vmatmul.mubr.f32.gmra.mrb[10].mxu0 %v31_v42 }
  0x49   :  { %410 = vmatprep.mubr.f32.mxu0 %v39_v43 }
  0x4c   :  { %411 = vmatmul.mubr.f32.gmra.mrb[12].mxu0 %v38_v44 }
  0x4d   :  { %415 = vmatprep.mubr.f32.mxu0 %v46_v45  ;;  %v678_v45 = vld [vmem:[%s1414_s4] ss:$0 sm:$0xff] }
  0x50   :  { %416 = vmatmul.mubr.f32.gmra.mrb[14].mxu0 %v45_v46 }
  0xf7   :  { %v716_v48 = vpop.f32.mrb[0].mxu0 }
  0xf8   :  { %v717_v50 = vpop.f32.mrb[1].mxu0 }
  0xf9   :  { %v760_v51 = vpop.f32.mrb[0].mxu1  ;;  %v718_v52 = vadd.f32 %v717_v50, %v716_v48 }
  0xfa   :  { %v761_v53 = vpop.f32.mrb[1].mxu1 }
  0xfb   :  { %v762_v54 = vadd.f32 %v761_v53, %v760_v51  ;;  %v233_v55 = vadd.f32 %v718_v52, %v673_v49  ;;  %v719_v56 = vpop.f32.mrb[2].mxu0 }
  0xfc   :  { %v720_v57 = vpop.f32.mrb[3].mxu0 }
  0xfd   :  { %v763_v58 = vpop.f32.mrb[2].mxu1  ;;  %v318_v59 = vadd.f32 %v762_v54, %v233_v55  ;;  %v721_v60 = vadd.f32 %v720_v57, %v719_v56 }
  0xfe   :  { %v764_v61 = vpop.f32.mrb[3].mxu1 }
  0xff   :  { %v765_v62 = vadd.f32 %v764_v61, %v763_v58  ;;  %v238_v63 = vadd.f32 %v721_v60, %v673_v49  ;;  %v722_v0 = vpop.f32.mrb[4].mxu0 }
 0x100   :  { %v723_v1 = vpop.f32.mrb[5].mxu0 }
 0x101   :  { %v766_v2 = vpop.f32.mrb[4].mxu1  ;;  %v323_v3 = vadd.f32 %v765_v62, %v238_v63  ;;  %v724_v4 = vadd.f32 %v723_v1, %v722_v0 }
 0x102   :  { %v767_v5 = vpop.f32.mrb[5].mxu1 }
 0x103   :  { %v768_v6 = vadd.f32 %v767_v5, %v766_v2  ;;  %v243_v7 = vadd.f32 %v724_v4, %v673_v49  ;;  %v725_v8 = vpop.f32.mrb[6].mxu0 }
 0x104   :  { %v726_v9 = vpop.f32.mrb[7].mxu0 }
 0x105   :  { %v769_v10 = vpop.f32.mrb[6].mxu1  ;;  %v328_v11 = vadd.f32 %v768_v6, %v243_v7  ;;  %v727_v12 = vadd.f32 %v726_v9, %v725_v8 }
 0x106   :  { %v770_v13 = vpop.f32.mrb[7].mxu1 }
 0x107   :  { %v771_v14 = vadd.f32 %v770_v13, %v769_v10  ;;  %v248_v15 = vadd.f32 %v727_v12, %v673_v49 }
 0x109   :  { %v833_v16 = vpop.f32.mrb[8].mxu1  ;;  %v333_v17 = vadd.f32 %v771_v14, %v248_v15 }
 0x10a   :  { %v487_v18 = vpop.f32.mrb[9].mxu1 }
 0x10d   :  { %v836_v19 = vpop.f32.mrb[10].mxu1 }
 0x10e   :  { %v497_v20 = vpop.f32.mrb[11].mxu1 }
 0x117   :  { %v804_v21 = vpop.f32.mrb[8].mxu0 }
 0x118   :  { %v805_v22 = vpop.f32.mrb[9].mxu0 }
 0x119   :  { %v806_v23 = vadd.f32 %v805_v22, %v804_v21 }
 0x11b   :  { %v807_v24 = vpop.f32.mrb[10].mxu0  ;;  %v403_v25 = vadd.f32 %v806_v23, %v318_v59 }
 0x11c   :  { %v808_v26 = vpop.f32.mrb[11].mxu0 }
 0x11d   :  { %v809_v27 = vadd.f32 %v808_v26, %v807_v24  ;;  %v488_v28 = vadd.f32 %v487_v18, %v403_v25 }
 0x11f   :  { %v408_v29 = vadd.f32 %v809_v27, %v323_v3  ;;  %v506_v30 = vmax.f32 %v488_v28, 0.0  ;;  %v810_v31 = vpop.f32.mrb[12].mxu0 }
 0x120   :  { %v811_v32 = vpop.f32.mrb[13].mxu0 }
 0x121   :  { %v493_v33 = vadd.f32 %v833_v16, %v408_v29  ;;  %v812_v34 = vadd.f32 %v811_v32, %v810_v31  ;;  %839 = vmatprep.mubr.msk.f32.mxu1 %vm518_vm2, %v506_v30 }
 0x123   :  { %v507_v35 = vmax.f32 %v493_v33, 0.0  ;;  %v813_v36 = vpop.f32.mrb[14].mxu0  ;;  %v413_v37 = vadd.f32 %v812_v34, %v328_v11 }
 0x124   :  { %v814_v38 = vpop.f32.mrb[15].mxu0 }
 0x125   :  { %v815_v39 = vadd.f32 %v814_v38, %v813_v36  ;;  %v498_v40 = vadd.f32 %v497_v20, %v413_v37  ;;  %840 = vmatmul.mubr.msk.f32.vlgmr.msra.gmra.mrb[12].mxu1 %vm518_vm2, %v507_v35 }
 0x127   :  { %v418_v41 = vadd.f32 %v815_v39, %v333_v17  ;;  %v508_v42 = vmax.f32 %v498_v40, 0.0 }
 0x129   :  { %v503_v43 = vadd.f32 %v836_v19, %v418_v41  ;;  %842 = vmatprep.mubr.msk.f32.mxu1 %vm518_vm2, %v508_v42 }
 0x12b   :  { %v509_v44 = vmax.f32 %v503_v43, 0.0 }
 0x12d   :  { %843 = vmatmul.mubr.msk.f32.gmra.mrb[14].mxu1 %vm518_vm2, %v509_v44 }
 0x1f8   :  { %v841_v46 = vpop.f32.mrb[12].mxu1 }
 0x1f9   :  { %v601_v47 = vpop.f32.mrb[13].mxu1  ;;  %v607_v49 = vadd.f32 %v841_v46, %v678_v45 }
 0x1fa   :  { %v602_v48 = vadd.f32 %v678_v45, %v601_v47 }
 0x1fb   :  { %v624_v52 = vsel %vm620_vm3, %v607_v49, -inf }
 0x1fc   :  { %v621_v50 = vsel %vm620_vm3, %v602_v48, -inf }
 0x1fd   :  { %622 = vmax.xlane.f32.xlu0 %v621_v50 }
 0x200   :  { %v844_v51 = vpop.f32.mrb[14].mxu1 }
 0x201   :  { %v611_v53 = vpop.f32.mrb[15].mxu1  ;;  %625 = vmax.xlane.f32.xlu0 %v624_v52  ;;  %v617_v55 = vadd.f32 %v844_v51, %v678_v45 }
 0x202   :  { %v612_v54 = vadd.f32 %v678_v45, %v611_v53 }
 0x203   :  { %v630_v57 = vsel %vm620_vm3, %v617_v55, -inf }
 0x204   :  { %v627_v56 = vsel %vm620_vm3, %v612_v54, -inf }
 0x205   :  { %628 = vmax.xlane.f32.xlu1 %v627_v56 }
 0x209   :  { %631 = vmax.xlane.f32.xlu1 %v630_v57 }
 0x28a   :  { %v623_v58 = vpop.xlane.xlu0 %622 }
 0x28b   :  { %v633_v59 = vsub.f32 %v602_v48, %v623_v58 }
 0x28d   :  { %v637_v60 = vmul.f32 1.442695, %v633_v59 }
 0x28e   :  { %v626_v61 = vpop.xlane.xlu0 %625 }
 0x28f   :  { %945 = vpow2.f32 %v637_v60  ;;  %v634_v62 = vsub.f32 %v607_v49, %v626_v61 }
 0x291   :  { %v639_v63 = vmul.f32 1.442695, %v634_v62 }
 0x292   :  { %v629_v0 = vpop.xlane.xlu1 %628 }
 0x293   :  { %947 = vpow2.f32 %v639_v63  ;;  %v635_v1 = vsub.f32 %v612_v54, %v629_v0 }
 0x295   :  { %v641_v2 = vmul.f32 1.442695, %v635_v1 }
 0x296   :  { %v632_v3 = vpop.xlane.xlu1 %631 }
 0x297   :  { %949 = vpow2.f32 %v641_v2  ;;  %v636_v4 = vsub.f32 %v617_v55, %v632_v3 }
 0x299   :  { %v946_v5 = vpop.eup %945  ;;  %v643_v6 = vmul.f32 1.442695, %v636_v4 }
 0x29a   :  { %v645_v7 = vsel %vm620_vm3, %v946_v5, 0.0 }
 0x29b   :  { %951 = vpow2.f32 %v643_v6  ;;  %646 = vadd.xlane.f32.xlu0 %v645_v7 }
 0x29d   :  { %v948_v8 = vpop.eup %947 }
 0x29e   :  { %v648_v9 = vsel %vm620_vm3, %v948_v8, 0.0 }
 0x29f   :  { %649 = vadd.xlane.f32.xlu1 %v648_v9 }
 0x2a1   :  { %v950_v10 = vpop.eup %949 }
 0x2a2   :  { %v651_v11 = vsel %vm620_vm3, %v950_v10, 0.0 }
 0x2a3   :  { %652 = vadd.xlane.f32.xlu0 %v651_v11 }
 0x2a5   :  { %v952_v12 = vpop.eup %951 }
 0x2a6   :  { %v654_v13 = vsel %vm620_vm3, %v952_v12, 0.0 }
 0x2a7   :  { %655 = vadd.xlane.f32.xlu1 %v654_v13 }
 0x328   :  { %v647_v14 = vpop.xlane.xlu0 %646 }
 0x329   :  { %953 = vrcp.f32 %v647_v14 }
 0x32c   :  { %v650_v15 = vpop.xlane.xlu1 %649 }
 0x32d   :  { %955 = vrcp.f32 %v650_v15 }
 0x330   :  { %v653_v16 = vpop.xlane.xlu0 %652 }
 0x331   :  { %957 = vrcp.f32 %v653_v16 }
 0x333   :  { %v954_v17 = vpop.eup %953 }
 0x334   :  { %v658_v18 = vmul.f32 %v954_v17, %v946_v5  ;;  %v656_v19 = vpop.xlane.xlu1 %655 }
 0x335   :  { %959 = vrcp.f32 %v656_v19 }
 0x336   :  { %665 = vst.msk [vmem:[%s1415_s5] sm:$0xff] %vm620_vm3, %v658_v18 }
 0x337   :  { %v956_v20 = vpop.eup %955 }
 0x338   :  { %v660_v21 = vmul.f32 %v956_v20, %v948_v8 }
 0x33a   :  { %666 = vst.msk [vmem:[%s1415_s5 + $0x8] sm:$0xff] %vm620_vm3, %v660_v21 }
 0x33b   :  { %v958_v22 = vpop.eup %957 }
 0x33c   :  { %v662_v23 = vmul.f32 %v958_v22, %v950_v10 }
 0x33e   :  { %667 = vst.msk [vmem:[%s1415_s5 + $0x10] sm:$0xff] %vm620_vm3, %v662_v23 }
 0x33f   :  { %v960_v24 = vpop.eup %959 }
 0x340   :  { %v664_v25 = vmul.f32 %v960_v24, %v952_v12 }
 0x342   :  { %668 = vst.msk [vmem:[%s1415_s5 + $0x18] sm:$0xff] %vm620_vm3, %v664_v25 }

</bundles_post_ra>
